<compile_context>
chip_gen: v7x
topology: tpu7x:2x2x1
jax: 0.10.0
libtpu: 0.0.40
codegen_flags: <defaults>
</compile_context>

<pallas_src>
import jax
import jax.numpy as jnp
import numpy as np
from jax.experimental import pallas as pl
from jax.experimental.pallas import tpu as pltpu

EPS = 1e-5
MAX_TILE_B = 1024  # batch-tile cap on the lane axis (review: 512-2048 is fine)


# ---------------- Fused Pallas kernel (the only device kernel) ----------------

def make_fused_kernel(n_emb, n_tail):
    """Ref layout:
        cat(int32), cont(bf16), tables[n_emb], w0_emb[n_emb], w0_cont, b0,
        (w, b) * n_tail  (hidden tail layers, then the output head), out_ref.
    All activations are (features, tile_b): batch sits on the 128-lane axis.
    """

    def kernel(*refs):
        cat_ref, cont_ref = refs[0], refs[1]
        tables = refs[2:2 + n_emb]
        w0_emb = refs[2 + n_emb:2 + 2 * n_emb]
        w0_cont_ref = refs[2 + 2 * n_emb]
        b0_ref = refs[3 + 2 * n_emb]
        tail = refs[4 + 2 * n_emb:-1]
        o_ref = refs[-1]

        cat = cat_ref[...]                                  # (n_emb, T) int32
        T = cat.shape[-1]

        # ---- first Linear (first_bn folded) as per-source partial sums ----
        acc = jnp.dot(w0_cont_ref[...], cont_ref[...],      # (D1, n_cont)@(n_cont, T)
                      preferred_element_type=jnp.float32)
        # Categorical features: gather == one-hot matmul on the MXU.
        for i in range(n_emb):
            tbl_t = tables[i][...]                          # (emb_dim_i, n_cat_i) bf16
            n_cat_i = tbl_t.shape[1]
            iota = jax.lax.broadcasted_iota(jnp.int32, (n_cat_i, T), 0)
            onehot = (iota == cat[i:i + 1, :]).astype(jnp.bfloat16)
            emb = jnp.dot(tbl_t, onehot,                    # exact bf16 rows
                          preferred_element_type=jnp.float32)
            acc = acc + jnp.dot(w0_emb[i][...], emb.astype(jnp.bfloat16),
                                preferred_element_type=jnp.float32)
        h = jnp.maximum(acc + b0_ref[...], 0.0)             # (D1, T) f32

        # ---- hidden tail: Linear + ReLU (following BN pre-folded) ----
        for j in range(n_tail - 1):
            w, b = tail[2 * j][...], tail[2 * j + 1][...]
            h = jnp.maximum(
                jnp.dot(w, h.astype(jnp.bfloat16),
                        preferred_element_type=jnp.float32) + b, 0.0)

        # ---- output head + sigmoid ----
        w, b = tail[-2][...], tail[-1][...]
        o_ref[...] = jax.nn.sigmoid(
            jnp.dot(w, h.astype(jnp.bfloat16),
                    preferred_element_type=jnp.float32) + b)

    return kernel


def _choose_tile_b(B):
    """Batch (lane-axis) tile. Small batches: one full-array tile.
    Large batches: lane-dense multiples of 128 with >= 2 grid steps so the
    'parallel' axis can shard across v7x's two TensorCores."""
    if B < 256:
        return B
    return min(MAX_TILE_B, max(128, (B // 2) // 128 * 128))


def feed_forward_nn(infer_params, cont_data, cat_data):
    """Whole (BN-folded) model in one pallas_call.
    cont_data: (B, n_cont) f32; cat_data: (B, n_emb) int32. Returns (B, out)."""
    ip = infer_params
    B = cat_data.shape[0]
    n_emb = len(ip["tables_t"])
    n_cont = cont_data.shape[1]
    n_tail = len(ip["layers_t"])
    out_dim = ip["layers_t"][-1][0].shape[0]

    tile_b = _choose_tile_b(B)
    Bp = pl.cdiv(B, tile_b) * tile_b

    # Put batch on the lane axis; stream cont features in bf16, indices as int32.
    cat_t = cat_data.T.astype(jnp.int32)             # (n_emb, B)
    cont_t = cont_data.T.astype(jnp.bfloat16)        # (n_cont, B)
    if Bp != B:                                      # pad lanes (index 0 is valid)
        cat_t = jnp.pad(cat_t, ((0, 0), (0, Bp - B)))
        cont_t = jnp.pad(cont_t, ((0, 0), (0, Bp - B)))

    def batch_spec(shape):
        return pl.BlockSpec(shape, lambda i: (0, i))

    def const_spec(shape):
        # Full-array, VMEM-resident block (constant index_map -> no re-DMA).
        return pl.BlockSpec(shape, lambda i: (0, 0))

    args = [cat_t, cont_t]
    in_specs = [batch_spec((n_emb, tile_b)), batch_spec((n_cont, tile_b))]
    for tbl in ip["tables_t"]:
        args.append(tbl); in_specs.append(const_spec(tbl.shape))
    for ch in ip["w0_emb_t"]:
        args.append(ch); in_specs.append(const_spec(ch.shape))
    args += [ip["w0_cont_t"], ip["b0_t"]]
    in_specs += [const_spec(ip["w0_cont_t"].shape), const_spec(ip["b0_t"].shape)]
    for w, b in ip["layers_t"]:
        args += [w, b]
        in_specs += [const_spec(w.shape), const_spec(b.shape)]

    # TODO(synk): if the cat/cont DMA is ever exposed at very large tiles, add
    # pipeline_mode=pl.Buffered(3) to the two batch specs (sweep, don't assume).
    out_t = pl.pallas_call(
        make_fused_kernel(n_emb, n_tail),
        grid=(Bp // tile_b,),
        out_shape=jax.ShapeDtypeStruct((out_dim, Bp), jnp.float32),
        in_specs=in_specs,
        out_specs=pl.BlockSpec((out_dim, tile_b), lambda i: (0, i)),
        compiler_params=pltpu.CompilerParams(
            dimension_semantics=("parallel",)),   # batch tiles shard over TCs
    )(*args)

    return out_t[:, :B].T                         # back to (B, out_dim)


# ---------------- Parameter construction (deterministic) ----------------

def make_params(key, emb_dims, no_of_cont, lin_layer_sizes, output_size):
    keys = iter(jax.random.split(key, 64))
    params = {}

    # Embedding tables: N(0, 1) like nn.Embedding default.
    params["emb_tables"] = [
        jax.random.normal(next(keys), (n, d), jnp.float32) for (n, d) in emb_dims
    ]
    no_of_embs = sum(d for _, d in emb_dims)

    def kaiming_linear(k, fan_in, fan_out):
        kw, kb = jax.random.split(k)
        w = jax.random.normal(kw, (fan_in, fan_out), jnp.float32) * np.sqrt(2.0 / fan_in)
        bound = 1.0 / np.sqrt(fan_in)
        b = jax.random.uniform(kb, (1, fan_out), jnp.float32, -bound, bound)
        return w, b

    def bn_params(k, c):
        k1, k2, k3, k4 = jax.random.split(k, 4)
        gamma = 1.0 + 0.1 * jax.random.normal(k1, (1, c), jnp.float32)
        beta = 0.1 * jax.random.normal(k2, (1, c), jnp.float32)
        mean = 0.1 * jax.random.normal(k3, (1, c), jnp.float32)
        var = jax.random.uniform(k4, (1, c), jnp.float32, 0.5, 1.5)
        return gamma, beta, mean, var

    params["first_bn"] = bn_params(next(keys), no_of_cont)

    sizes = [no_of_embs + no_of_cont] + list(lin_layer_sizes)
    params["lin"] = [
        kaiming_linear(next(keys), sizes[i], sizes[i + 1])
        for i in range(len(lin_layer_sizes))
    ]
    params["bn"] = [bn_params(next(keys), s) for s in lin_layer_sizes]
    params["out"] = kaiming_linear(next(keys), lin_layer_sizes[-1], output_size)
    return params


def build_inference_params(params, emb_dims, no_of_cont):
    """Fold eval-mode BNs into the consuming Linear, transpose everything so the
    batch can sit on the lane axis, split the first Linear per input source, and
    cast the streamed tensors (weights / tables) to bf16. Biases stay f32."""

    def bn_scale_shift(bn):
        g, beta, m, v = bn
        s = g * jax.lax.rsqrt(v + EPS)   # (1, C)
        t = beta - m * s                 # (1, C)
        return s, t

    w0, b0 = params["lin"][0]                     # (D0, D1), (1, D1)
    s, t = bn_scale_shift(params["first_bn"])     # act on continuous rows only
    no_of_embs = w0.shape[0] - no_of_cont
    w0_emb = w0[:no_of_embs]
    w0_cont = w0[no_of_embs:]
    b0_eff = b0 + t @ w0_cont

    # Split the embedding rows of W0 per categorical feature and transpose.
    w0_emb_t, off = [], 0
    for (_, d) in emb_dims:
        w0_emb_t.append(w0_emb[off:off + d].T.astype(jnp.bfloat16))  # (D1, d)
        off += d
    w0_cont_t = (w0_cont * s.T).T.astype(jnp.bfloat16)               # (D1, n_cont)
    tables_t = [tbl.T.astype(jnp.bfloat16) for tbl in params["emb_tables"]]

    layers_t = []
    following = list(params["lin"][1:]) + [params["out"]]
    for (w, b), bn in zip(following, params["bn"]):
        s, t = bn_scale_shift(bn)                 # (1, in_features)
        w_eff = w * s.T
        b_eff = b + t @ w
        layers_t.append((w_eff.T.astype(jnp.bfloat16),                # (out, in)
                         b_eff.T.astype(jnp.float32)))                # (out, 1)

    return {
        "tables_t": tables_t,
        "w0_emb_t": w0_emb_t,
        "w0_cont_t": w0_cont_t,
        "b0_t": b0_eff.T.astype(jnp.float32),     # (D1, 1)
        "layers_t": layers_t,                     # hidden tail ... output head
    }


# ---------------- Pure-JAX reference (original, un-folded structure) ----------------

def feed_forward_nn_ref(params, cont_data, cat_data):
    embs = [jnp.take(tbl, cat_data[:, i], axis=0)
            for i, tbl in enumerate(params["emb_tables"])]
    x = jnp.concatenate(embs, axis=1)
    g, bta, m, v = params["first_bn"]
    cont_norm = (cont_data - m) * jax.lax.rsqrt(v + EPS) * g + bta
    x = jnp.concatenate([x, cont_norm], axis=1)
    for (w, b), (g, bta, m, v) in zip(params["lin"], params["bn"]):
        x = jnp.maximum(x @ w + b, 0.0)
        x = (x - m) * jax.lax.rsqrt(v + EPS) * g + bta
    w_out, b_out = params["out"]
    return jax.nn.sigmoid(x @ w_out + b_out)


# ---------------- Demo / correctness check ----------------

if __name__ == "__main__":
    emb_dims = [(10, 4), (8, 3)]        # two categorical features
    no_of_cont = 5
    lin_layer_sizes = [32, 16]
    output_size = 4
    batch = 8

    key = jax.random.PRNGKey(0)
    kp, kc, kcat = jax.random.split(key, 3)

    params = make_params(kp, emb_dims, no_of_cont, lin_layer_sizes, output_size)
    infer_params = build_inference_params(params, emb_dims, no_of_cont)

    def make_inputs(kc_, kcat_, b):
        cont = jax.random.normal(kc_, (b, no_of_cont), jnp.float32)
        cat = jnp.stack(
            [jax.random.randint(jax.random.fold_in(kcat_, i), (b,), 0, n)
             for i, (n, _) in enumerate(emb_dims)], axis=1).astype(jnp.int32)
        return cont, cat

    fwd = jax.jit(feed_forward_nn)

    # Small batch (latency regime, grid=(1,), full-array lane tile).
    cont_data, cat_data = make_inputs(kc, kcat, batch)
    out = jax.block_until_ready(fwd(infer_params, cont_data, cat_data))
    ref = feed_forward_nn_ref(params, cont_data, cat_data)
    assert out.shape == (batch, output_size)
    np.testing.assert_allclose(np.asarray(out), np.asarray(ref), rtol=2e-2, atol=2e-2)

    # Larger batch: exercises 128-lane tiles, lane padding and the parallel grid.
    kc2, kcat2 = jax.random.split(jax.random.fold_in(key, 7))
    batch2 = 300                         # -> tile_b=128, padded to 384, grid=(3,)
    cont2, cat2 = make_inputs(kc2, kcat2, batch2)
    out2 = jax.block_until_ready(fwd(infer_params, cont2, cat2))
    ref2 = feed_forward_nn_ref(params, cont2, cat2)
    assert out2.shape == (batch2, output_size)
    np.testing.assert_allclose(np.asarray(out2), np.asarray(ref2), rtol=2e-2, atol=2e-2)

    print("KERNEL_OK")
</pallas_src>

<mosaic_0001>
module attributes {stable_mosaic.version = 11 : i64} {
  func.func @kernel(%arg0: i32, %arg1: memref<2x8xi32, #tpu.memory_space<vmem>>, %arg2: memref<5x8xbf16, #tpu.memory_space<vmem>>, %arg3: memref<4x10xbf16, #tpu.memory_space<vmem>>, %arg4: memref<3x8xbf16, #tpu.memory_space<vmem>>, %arg5: memref<32x4xbf16, #tpu.memory_space<vmem>>, %arg6: memref<32x3xbf16, #tpu.memory_space<vmem>>, %arg7: memref<32x5xbf16, #tpu.memory_space<vmem>>, %arg8: memref<32x1xf32, #tpu.memory_space<vmem>>, %arg9: memref<16x32xbf16, #tpu.memory_space<vmem>>, %arg10: memref<16x1xf32, #tpu.memory_space<vmem>>, %arg11: memref<4x16xbf16, #tpu.memory_space<vmem>>, %arg12: memref<4x1xf32, #tpu.memory_space<vmem>>, %arg13: memref<4x8xf32, #tpu.memory_space<vmem>>) attributes {dimension_semantics = [#tpu.dimension_semantics<parallel>], iteration_bounds = array<i64: 1>, scalar_prefetch = 0 : i64, scratch_operands = 0 : i64, tpu.core_type = #tpu.core_type<tc>, window_params = [{transform_indices = @transform_0, window_bounds = array<i64: 2, 8>}, {transform_indices = @transform_1, window_bounds = array<i64: 5, 8>}, {pipeline_mode = #tpu.pipeline_mode<synchronous>, transform_indices = @transform_2, window_bounds = array<i64: 4, 10>}, {pipeline_mode = #tpu.pipeline_mode<synchronous>, transform_indices = @transform_3, window_bounds = array<i64: 3, 8>}, {pipeline_mode = #tpu.pipeline_mode<synchronous>, transform_indices = @transform_4, window_bounds = array<i64: 32, 4>}, {pipeline_mode = #tpu.pipeline_mode<synchronous>, transform_indices = @transform_5, window_bounds = array<i64: 32, 3>}, {pipeline_mode = #tpu.pipeline_mode<synchronous>, transform_indices = @transform_6, window_bounds = array<i64: 32, 5>}, {pipeline_mode = #tpu.pipeline_mode<synchronous>, transform_indices = @transform_7, window_bounds = array<i64: 32, 1>}, {pipeline_mode = #tpu.pipeline_mode<synchronous>, transform_indices = @transform_8, window_bounds = array<i64: 16, 32>}, {pipeline_mode = #tpu.pipeline_mode<synchronous>, transform_indices = @transform_9, window_bounds = array<i64: 16, 1>}, {pipeline_mode = #tpu.pipeline_mode<synchronous>, transform_indices = @transform_10, window_bounds = array<i64: 4, 16>}, {pipeline_mode = #tpu.pipeline_mode<synchronous>, transform_indices = @transform_11, window_bounds = array<i64: 4, 1>}, {transform_indices = @transform_12, window_bounds = array<i64: 4, 8>}]} {
    %c0 = arith.constant 0 : index
    %c0_0 = arith.constant 0 : index
    %0 = vector.load %arg1[%c0, %c0_0] : memref<2x8xi32, #tpu.memory_space<vmem>>, vector<2x8xi32>
    %c0_1 = arith.constant 0 : index
    %c0_2 = arith.constant 0 : index
    %1 = vector.load %arg7[%c0_1, %c0_2] : memref<32x5xbf16, #tpu.memory_space<vmem>>, vector<32x5xbf16>
    %c0_3 = arith.constant 0 : index
    %c0_4 = arith.constant 0 : index
    %2 = vector.load %arg2[%c0_3, %c0_4] : memref<5x8xbf16, #tpu.memory_space<vmem>>, vector<5x8xbf16>
    %cst = arith.constant dense<0.000000e+00> : vector<32x8xf32>
    %3 = tpu.matmul %1, %2, %cst {dimension_numbers = #tpu.dot_dimension_numbers<[1], [0], [0], [1], [0, 0, 1, 1], [], []>} : vector<32x5xbf16>, vector<5x8xbf16>, vector<32x8xf32> -> vector<32x8xf32>
    %c0_5 = arith.constant 0 : index
    %c0_6 = arith.constant 0 : index
    %4 = vector.load %arg3[%c0_5, %c0_6] : memref<4x10xbf16, #tpu.memory_space<vmem>>, vector<4x10xbf16>
    %5 = tpu.iota {dimensions = array<i32: 0>} : vector<10x8xi32>
    %6 = vector.extract_strided_slice %0 {offsets = [0, 0], sizes = [1, 8], strides = [1, 1]} : vector<2x8xi32> to vector<1x8xi32>
    %7 = vector.broadcast %6 : vector<1x8xi32> to vector<10x8xi32>
    %8 = arith.cmpi eq, %5, %7 : vector<10x8xi32>
    %9 = arith.extui %8 : vector<10x8xi1> to vector<10x8xi32>
    %10 = arith.sitofp %9 : vector<10x8xi32> to vector<10x8xf32>
    %11 = arith.truncf %10 : vector<10x8xf32> to vector<10x8xbf16>
    %cst_7 = arith.constant dense<0.000000e+00> : vector<4x8xf32>
    %12 = tpu.matmul %4, %11, %cst_7 {dimension_numbers = #tpu.dot_dimension_numbers<[1], [0], [0], [1], [0, 0, 1, 1], [], []>} : vector<4x10xbf16>, vector<10x8xbf16>, vector<4x8xf32> -> vector<4x8xf32>
    %c0_8 = arith.constant 0 : index
    %c0_9 = arith.constant 0 : index
    %13 = vector.load %arg5[%c0_8, %c0_9] : memref<32x4xbf16, #tpu.memory_space<vmem>>, vector<32x4xbf16>
    %14 = arith.truncf %12 : vector<4x8xf32> to vector<4x8xbf16>
    %cst_10 = arith.constant dense<0.000000e+00> : vector<32x8xf32>
    %15 = tpu.matmul %13, %14, %cst_10 {dimension_numbers = #tpu.dot_dimension_numbers<[1], [0], [0], [1], [0, 0, 1, 1], [], []>} : vector<32x4xbf16>, vector<4x8xbf16>, vector<32x8xf32> -> vector<32x8xf32>
    %16 = arith.addf %3, %15 : vector<32x8xf32>
    %c0_11 = arith.constant 0 : index
    %c0_12 = arith.constant 0 : index
    %17 = vector.load %arg4[%c0_11, %c0_12] : memref<3x8xbf16, #tpu.memory_space<vmem>>, vector<3x8xbf16>
    %18 = tpu.iota {dimensions = array<i32: 0>} : vector<8x8xi32>
    %19 = vector.extract_strided_slice %0 {offsets = [1, 0], sizes = [1, 8], strides = [1, 1]} : vector<2x8xi32> to vector<1x8xi32>
    %20 = vector.broadcast %19 : vector<1x8xi32> to vector<8x8xi32>
    %21 = arith.cmpi eq, %18, %20 : vector<8x8xi32>
    %22 = arith.extui %21 : vector<8x8xi1> to vector<8x8xi32>
    %23 = arith.sitofp %22 : vector<8x8xi32> to vector<8x8xf32>
    %24 = arith.truncf %23 : vector<8x8xf32> to vector<8x8xbf16>
    %cst_13 = arith.constant dense<0.000000e+00> : vector<3x8xf32>
    %25 = tpu.matmul %17, %24, %cst_13 {dimension_numbers = #tpu.dot_dimension_numbers<[1], [0], [0], [1], [0, 0, 1, 1], [], []>} : vector<3x8xbf16>, vector<8x8xbf16>, vector<3x8xf32> -> vector<3x8xf32>
    %c0_14 = arith.constant 0 : index
    %c0_15 = arith.constant 0 : index
    %26 = vector.load %arg6[%c0_14, %c0_15] : memref<32x3xbf16, #tpu.memory_space<vmem>>, vector<32x3xbf16>
    %27 = arith.truncf %25 : vector<3x8xf32> to vector<3x8xbf16>
    %cst_16 = arith.constant dense<0.000000e+00> : vector<32x8xf32>
    %28 = tpu.matmul %26, %27, %cst_16 {dimension_numbers = #tpu.dot_dimension_numbers<[1], [0], [0], [1], [0, 0, 1, 1], [], []>} : vector<32x3xbf16>, vector<3x8xbf16>, vector<32x8xf32> -> vector<32x8xf32>
    %29 = arith.addf %16, %28 : vector<32x8xf32>
    %c0_17 = arith.constant 0 : index
    %c0_18 = arith.constant 0 : index
    %30 = vector.load %arg8[%c0_17, %c0_18] : memref<32x1xf32, #tpu.memory_space<vmem>>, vector<32x1xf32>
    %31 = vector.broadcast %30 : vector<32x1xf32> to vector<32x8xf32>
    %32 = arith.addf %29, %31 : vector<32x8xf32>
    %cst_19 = arith.constant 0.000000e+00 : f32
    %33 = vector.broadcast %cst_19 : f32 to vector<32x8xf32>
    %34 = arith.maximumf %32, %33 : vector<32x8xf32>
    %c0_20 = arith.constant 0 : index
    %c0_21 = arith.constant 0 : index
    %35 = vector.load %arg9[%c0_20, %c0_21] : memref<16x32xbf16, #tpu.memory_space<vmem>>, vector<16x32xbf16>
    %c0_22 = arith.constant 0 : index
    %c0_23 = arith.constant 0 : index
    %36 = vector.load %arg10[%c0_22, %c0_23] : memref<16x1xf32, #tpu.memory_space<vmem>>, vector<16x1xf32>
    %37 = arith.truncf %34 : vector<32x8xf32> to vector<32x8xbf16>
    %cst_24 = arith.constant dense<0.000000e+00> : vector<16x8xf32>
    %38 = tpu.matmul %35, %37, %cst_24 {dimension_numbers = #tpu.dot_dimension_numbers<[1], [0], [0], [1], [0, 0, 1, 1], [], []>} : vector<16x32xbf16>, vector<32x8xbf16>, vector<16x8xf32> -> vector<16x8xf32>
    %39 = vector.broadcast %36 : vector<16x1xf32> to vector<16x8xf32>
    %40 = arith.addf %38, %39 : vector<16x8xf32>
    %cst_25 = arith.constant 0.000000e+00 : f32
    %41 = vector.broadcast %cst_25 : f32 to vector<16x8xf32>
    %42 = arith.maximumf %40, %41 : vector<16x8xf32>
    %c0_26 = arith.constant 0 : index
    %c0_27 = arith.constant 0 : index
    %43 = vector.load %arg11[%c0_26, %c0_27] : memref<4x16xbf16, #tpu.memory_space<vmem>>, vector<4x16xbf16>
    %c0_28 = arith.constant 0 : index
    %c0_29 = arith.constant 0 : index
    %44 = vector.load %arg12[%c0_28, %c0_29] : memref<4x1xf32, #tpu.memory_space<vmem>>, vector<4x1xf32>
    %45 = arith.truncf %42 : vector<16x8xf32> to vector<16x8xbf16>
    %cst_30 = arith.constant dense<0.000000e+00> : vector<4x8xf32>
    %46 = tpu.matmul %43, %45, %cst_30 {dimension_numbers = #tpu.dot_dimension_numbers<[1], [0], [0], [1], [0, 0, 1, 1], [], []>} : vector<4x16xbf16>, vector<16x8xbf16>, vector<4x8xf32> -> vector<4x8xf32>
    %47 = vector.broadcast %44 : vector<4x1xf32> to vector<4x8xf32>
    %48 = arith.addf %46, %47 : vector<4x8xf32>
    %49 = arith.negf %48 : vector<4x8xf32>
    %50 = math.exp %49 : vector<4x8xf32>
    %cst_31 = arith.constant 1.000000e+00 : f32
    %51 = vector.broadcast %cst_31 : f32 to vector<4x8xf32>
    %52 = arith.addf %51, %50 : vector<4x8xf32>
    %53 = arith.divf %51, %52 : vector<4x8xf32>
    %c0_32 = arith.constant 0 : index
    %c0_33 = arith.constant 0 : index
    %54 = vector.load %arg13[%c0_32, %c0_33] : memref<4x8xf32, #tpu.memory_space<vmem>>, vector<4x8xf32>
    tpu.vector_store %arg13[%c0_32, %c0_33], %53 {strides = array<i32>} : memref<4x8xf32, #tpu.memory_space<vmem>>, vector<4x8xf32>,
    return
  }
  func.func @transform_0(%arg0: i32) -> (i32, i32) {
    %c0_i32 = arith.constant 0 : i32
    %c0_i32_0 = arith.constant 0 : i32
    return %c0_i32, %arg0 : i32, i32
  }
  func.func @transform_1(%arg0: i32) -> (i32, i32) {
    %c0_i32 = arith.constant 0 : i32
    %c0_i32_0 = arith.constant 0 : i32
    return %c0_i32, %arg0 : i32, i32
  }
  func.func @transform_2(%arg0: i32) -> (i32, i32) {
    %c0_i32 = arith.constant 0 : i32
    %c0_i32_0 = arith.constant 0 : i32
    %c0_i32_1 = arith.constant 0 : i32
    return %c0_i32, %c0_i32_0 : i32, i32
  }
  func.func @transform_3(%arg0: i32) -> (i32, i32) {
    %c0_i32 = arith.constant 0 : i32
    %c0_i32_0 = arith.constant 0 : i32
    %c0_i32_1 = arith.constant 0 : i32
    return %c0_i32, %c0_i32_0 : i32, i32
  }
  func.func @transform_4(%arg0: i32) -> (i32, i32) {
    %c0_i32 = arith.constant 0 : i32
    %c0_i32_0 = arith.constant 0 : i32
    %c0_i32_1 = arith.constant 0 : i32
    return %c0_i32, %c0_i32_0 : i32, i32
  }
  func.func @transform_5(%arg0: i32) -> (i32, i32) {
    %c0_i32 = arith.constant 0 : i32
    %c0_i32_0 = arith.constant 0 : i32
    %c0_i32_1 = arith.constant 0 : i32
    return %c0_i32, %c0_i32_0 : i32, i32
  }
  func.func @transform_6(%arg0: i32) -> (i32, i32) {
    %c0_i32 = arith.constant 0 : i32
    %c0_i32_0 = arith.constant 0 : i32
    %c0_i32_1 = arith.constant 0 : i32
    return %c0_i32, %c0_i32_0 : i32, i32
  }
  func.func @transform_7(%arg0: i32) -> (i32, i32) {
    %c0_i32 = arith.constant 0 : i32
    %c0_i32_0 = arith.constant 0 : i32
    %c0_i32_1 = arith.constant 0 : i32
    return %c0_i32, %c0_i32_0 : i32, i32
  }
  func.func @transform_8(%arg0: i32) -> (i32, i32) {
    %c0_i32 = arith.constant 0 : i32
    %c0_i32_0 = arith.constant 0 : i32
    %c0_i32_1 = arith.constant 0 : i32
    return %c0_i32, %c0_i32_0 : i32, i32
  }
  func.func @transform_9(%arg0: i32) -> (i32, i32) {
    %c0_i32 = arith.constant 0 : i32
    %c0_i32_0 = arith.constant 0 : i32
    %c0_i32_1 = arith.constant 0 : i32
    return %c0_i32, %c0_i32_0 : i32, i32
  }
  func.func @transform_10(%arg0: i32) -> (i32, i32) {
    %c0_i32 = arith.constant 0 : i32
    %c0_i32_0 = arith.constant 0 : i32
    %c0_i32_1 = arith.constant 0 : i32
    return %c0_i32, %c0_i32_0 : i32, i32
  }
  func.func @transform_11(%arg0: i32) -> (i32, i32) {
    %c0_i32 = arith.constant 0 : i32
    %c0_i32_0 = arith.constant 0 : i32
    %c0_i32_1 = arith.constant 0 : i32
    return %c0_i32, %c0_i32_0 : i32, i32
  }
  func.func @transform_12(%arg0: i32) -> (i32, i32) {
    %c0_i32 = arith.constant 0 : i32
    %c0_i32_0 = arith.constant 0 : i32
    return %c0_i32, %arg0 : i32, i32
  }
}

</mosaic_0001>

<bundles_post_ra>
// kernel: feed_forward_nn.1
= control target key start
LH: loop header
LB: loop body
LE: loop exit
PB: predicated region body
PF: predicated region fallthrough
CT: control target
= control target key end

     0   :  { %v50_v0 = vlaneseq  ;;  %v705_v1 = vmov 0.0   ;;  %vm706_vm0 = vmmov 0   ;;  %s866_s0 = inlined_call_operand.vmem [shape: s32[2,8], index: 0, kind: input, shape index: {}]   ;;  %s867_s1 = inlined_call_operand.vmem [shape: bf16[5,8], index: 1, kind: input, shape index: {}]   ;;  %s868_s2 = inlined_call_operand.vmem [shape: bf16[4,10], index: 2, kind: input, shape index: {}]   ;;  %s869_s3 = inlined_call_operand.vmem [shape: bf16[3,8], index: 3, kind: input, shape index: {}]   ;;  %s870_s4 = inlined_call_operand.vmem [shape: bf16[32,4], index: 4, kind: input, shape index: {}]   ;;  %s871_s5 = inlined_call_operand.vmem [shape: bf16[32,3], index: 5, kind: input, shape index: {}]   ;;  %s872_s6 = inlined_call_operand.vmem [shape: bf16[32,5], index: 6, kind: input, shape index: {}]   ;;  %s873_s7 = inlined_call_operand.vmem [shape: f32[32,1], index: 7, kind: input, shape index: {}]   ;;  %s874_s8 = inlined_call_operand.vmem [shape: bf16[16,32], index: 8, kind: input, shape index: {}]   ;;  %s875_s9 = inlined_call_operand.vmem [shape: f32[16,1], index: 9, kind: input, shape index: {}]   ;;  %s876_s10 = inlined_call_operand.vmem [shape: bf16[4,16], index: 10, kind: input, shape index: {}]   ;;  %s877_s11 = inlined_call_operand.vmem [shape: f32[4,1], index: 11, kind: input, shape index: {}]   ;;  %s878_s12 = inlined_call_operand.hbm [shape: f32[4,8], index: 12, kind: output, shape index: {}]  }
   0x1   :  { %610 = vmatprep.subr.bf16.mxu0 %v705_v1  ;;  %v43_v2 = vld [vmem:[%s866_s0] sm:$0x3]  ;;  %612 = vmatprep.mubr.msk.bf16.mxu0 %vm706_vm0, %v705_v1 }
   0x2   :  { %v51_v3 = vshrl.u32 %v50_v0, 7 }
   0x4   :  { %v52_v4 = vadd.s32 8, %v51_v3  ;;  %v55_v5 = vsub.s32 0, %v51_v3  ;;  %v262_v6 = vsub.s32 1, %v51_v3 }
   0x6   :  { %v56_v7 = vrot.slane %v43_v2, %v55_v5  ;;  %v263_v8 = vrot.slane %v43_v2, %v262_v6 }
   0x7   :  { %17 = vsyncpa [#allocation3], 0  ;;  %vm68_vm4 = vcmask 1044480   ;;  %vm272_vm5 = vcmask 1043456   ;;  %v49_v15 = vld [vmem:[%s868_s2] sm:$0x3] }
   0x8   :  { %vm57_vm1 = vcmp.eq.s32.totalorder %v51_v3, %v56_v7  ;;  %vm58_vm2 = vcmp.eq.s32.totalorder %v52_v4, %v56_v7  ;;  %vm264_vm3 = vcmp.eq.s32.totalorder %v51_v3, %v263_v8  ;;  %vm64_vm6 = vcmask 80896   ;;  %v259_v17 = vld [vmem:[%s869_s3] sm:$0x3]  ;;  %v399_v20 = vld [vmem:[%s873_s7 + $0x10] sm:$0xff]  ;;  %v398_v22 = vld [vmem:[%s873_s7 + $0x8] sm:$0xff]  ;;  %s709_s28 = smov [#allocation2]  }
   0x9   :  { %v571_v9 = vsel %vm57_vm1, 1.0, %v705_v1  ;;  %v572_v10 = vsel %vm58_vm2, 1.0, %v705_v1  ;;  %v582_v11 = vsel %vm264_vm3, 1.0, %v705_v1  ;;  %vm268_vm7 = vcmask 64512   ;;  %v670_v18 = vld [vmem:[%s870_s4] sm:$0xff]   ;;  %v400_v23 = vld [vmem:[%s873_s7 + $0x18] sm:$0xff] }
   0xa   :  { %v63_v12 = vpack.c.bf16 %v572_v10, %v571_v9  ;;  %v267_v13 = vpack.c.bf16 %v582_v11, %v582_v11  ;;  %vm127_vm8 = vcmask 31744   ;;  %v397_v19 = vld [vmem:[%s873_s7] sm:$0xff]  ;;  %v707_v21 = vmov 0   ;;  %v432_v25 = vld [vmem:[%s875_s9 + $0x8] sm:$0xff]  ;;  %s563_s29 = sshll.u32 %s709_s28, 4  ;;  %s564_s29 = int_to_ptr.vmem [resolvable:$true] %s563_s29 }
   0xb   :  { %618 = vmatprep.mubr.msk.bf16.mxu1 %vm127_vm8, %v670_v18  ;;  %668 = vset.pattern.permute.xlu0 %v707_v21  ;;  %v431_v24 = vld [vmem:[%s875_s9] sm:$0xff]  ;;  %vm134_vm9 = vcmask 1041408   ;;  %vm204_vm10 = vcmask 1042432   ;;  %v708_v27 = vmov 65535   ;;  %vm338_vm11 = vcmask 1040384   ;;  %v671_v38 = vld [vmem:[%s870_s4 + $0x8] sm:$0xff]   ;;  %p686_p1 = scmp.lt.s32.totalorder %s564_s29, %s564_s29 }
   0xc   :  { %v70_v14 = vsel %vm68_vm4, %v63_v12, 0  ;;  %v274_v16 = vsel %vm272_vm5, %v267_v13, 0  ;;  %669 = vset.pattern.permute.xlu1 %v707_v21  ;;  %403 = vperm.xlu0 %668, %v397_v19   ;;  %v498_v26 = vld [vmem:[%s877_s11] sm:$0xf]  ;;  %v205_v28 = vsel %vm134_vm9, 4294967295, %v708_v27  ;;  %v339_v40 = vsel %vm338_vm11, 4294967295, %v708_v27 }
   0xd   :  { %611 = vmatpush3.bf16.msra.mxu0 %v70_v14  ;;  %413 = vperm.xlu1 %669, %v399_v20   ;;  %v48_v29 = vld [vmem:[%s867_s1] sm:$0x7]  ;;  %v206_v30 = vsel %vm204_vm10, %v205_v28, 0  ;;  %vm197_vm12 = vcmask 39936   ;;  %v340_v42 = vsel %vm134_vm9, %v339_v40, 0  ;;  %v673_v48 = vld [vmem:[%s872_s6 + $0x8] sm:$0xff]  }
   0xe   :  { %628 = vmatprep.subr.bf16.mxu0 %v705_v1  ;;  %v208_v34 = vand.u32 %v206_v30, %v48_v29  ;;  %v672_v39 = vld [vmem:[%s872_s6] sm:$0xff]   ;;  %vm331_vm13 = vcmask 23552   ;;  %v675_v50 = vld [vmem:[%s871_s5 + $0x8] sm:$0xff]   ;;  %vm450_vm14 = vcmask 261120   ;;  %vm505_vm15 = vcmask 130048  }
   0xf   :  { %v674_v49 = vld [vmem:[%s871_s5] sm:$0xff]  }
  0x10   :  { %613 = vmatmul.mubr.msk.bf16.vlgmr.msra.gmra.mrb[0].mxu0 %vm64_vm6, %v49_v15  ;;  %408 = vperm.xlu0 %668, %v398_v22   ;;  %v676_v6 = vld [vmem:[%s874_s8] sm:$0xff]  }
  0x11   :  { %629 = vmatpush3.bf16.msra.mxu0 %v274_v16  ;;  %630 = vmatprep.mubr.msk.bf16.mxu0 %vm706_vm0, %v705_v1  ;;  %v497_v18 = vld [vmem:[%s876_s10] sm:$0x3]  ;;  %s681_s10 = scalar_lea.vmem %s564_s29, 64 }
  0x12   :  { %640 = vmatprep.subr.bf16.mxu0 %v705_v1  ;;  %418 = vperm.xlu1 %669, %v400_v23   ;;  %p682_p0 = scmp.ne.s32.totalorder %s564_s29, %s681_s10  ;;  %p687_p2 = scmp.lt.s32.totalorder %s681_s10, %s681_s10 }
  0x14   :  { %437 = vperm.xlu0 %668, %v431_v24   ;;  %p688_p3 = por %p687_p2, %p686_p1 }
  0x16   :  { %442 = vperm.xlu1 %669, %v432_v25   ;;  %p689_p4 = pnand %p688_p3, %p682_p0 }
  0x18   :  { %631 = vmatmul.mubr.msk.bf16.vlgmr.msra.gmra.mrb[4].mxu0 %vm268_vm7, %v259_v17  ;;  %502 = vperm.xlu0 %668, %v498_v26  }
  0x19   :  { %644 = vmatprep.mubr.msk.bf16.mxu0 %vm706_vm0, %v705_v1 }
  0x8b   :  { %v404_v52 = vpop.permute.xlu0 %403 }
  0x8c   :  { %v414_v51 = vpop.permute.xlu1 %413 }
  0x8f   :  { %v409_v59 = vpop.permute.xlu0 %408 }
  0x91   :  { %v419_v56 = vpop.permute.xlu1 %418 }
  0x93   :  { %v438_v7 = vpop.permute.xlu0 %437 }
  0x95   :  { %v443_v11 = vpop.permute.xlu1 %442 }
  0x97   :  { %v503_v19 = vpop.permute.xlu0 %502 }
  0xe3   :  { %v106_v31 = vpop.f32.mrb[0].mxu0 }
  0xe4   :  { %v116_v32 = vpack.c.bf16 %v106_v31, %v106_v31  ;;  %v614_v33 = vpop.f32.mrb[1].mxu0 }
  0xe5   :  { %v109_v35 = vpop.f32.mrb[2].mxu0 }
  0xe6   :  { %v615_v36 = vpop.f32.mrb[3].mxu0  ;;  %662 = vmatprep.subr.msk.bf16.mxu1 %vm134_vm9, %v116_v32  ;;  %v136_v37 = vsel %vm134_vm9, %v116_v32, 0 }
  0xe7   :  { %617 = vmatpush3.bf16.msra.mxu1 %v136_v37 }
  0xe8   :  { %622 = vmatprep.subr.bf16.mxu1 %v208_v34 }
  0xea   :  { %619 = vmatmul.mubr.msk.bf16.vlgmr.msra.gmra.mrb[0].mxu1 %vm127_vm8, %v671_v38 }
  0xeb   :  { %623 = vmatpush3.bf16.msra.mxu1 %v208_v34  ;;  %v310_v41 = vpop.f32.mrb[4].mxu0  ;;  %624 = vmatprep.mubr.msk.bf16.mxu1 %vm197_vm12, %v672_v39 }
  0xec   :  { %v320_v43 = vpack.c.bf16 %v310_v41, %v310_v41  ;;  %v632_v44 = vpop.f32.mrb[5].mxu0 }
  0xed   :  { %v313_v45 = vpop.f32.mrb[6].mxu0 }
  0xee   :  { %v342_v46 = vand.u32 %v340_v42, %v320_v43  ;;  %v633_v47 = vpop.f32.mrb[7].mxu0 }
  0xf0   :  { %634 = vmatprep.subr.bf16.mxu1 %v342_v46 }
  0xf6   :  { %625 = vmatmul.mubr.msk.bf16.vlgmr.msra.gmra.mrb[0].mxu1 %vm197_vm12, %v673_v48 }
  0xf7   :  { %635 = vmatpush3.bf16.msra.mxu1 %v342_v46  ;;  %636 = vmatprep.mubr.msk.bf16.mxu1 %vm331_vm13, %v674_v49 }
 0x102   :  { %637 = vmatmul.mubr.msk.bf16.vlgmr.msra.gmra.mrb[0].mxu1 %vm331_vm13, %v675_v50 }
 0x1d5   :  { %v638_v53 = vpop.f32.mrb[0].mxu1 }
 0x1d6   :  { %v423_v54 = vadd.f32 %v638_v53, %v414_v51  ;;  %v378_v55 = vpop.f32.mrb[1].mxu1 }
 0x1d7   :  { %v421_v57 = vadd.f32 %v404_v52, %v378_v55  ;;  %v639_v58 = vpop.f32.mrb[2].mxu1 }
 0x1d8   :  { %v424_v60 = vadd.f32 %v639_v58, %v419_v56  ;;  %v381_v61 = vpop.f32.mrb[3].mxu1  ;;  %v427_v63 = vmax.f32 %v423_v54, 0.0 }
 0x1d9   :  { %v422_v62 = vadd.f32 %v409_v59, %v381_v61  ;;  %v425_v2 = vmax.f32 %v421_v57, 0.0 }
 0x1da   :  { %v428_v0 = vmax.f32 %v424_v60, 0.0 }
 0x1db   :  { %v426_v3 = vmax.f32 %v422_v62, 0.0 }
 0x1dc   :  { %v434_v4 = vpack.c.bf16 %v428_v0, %v427_v63 }
 0x1dd   :  { %v433_v5 = vpack.c.bf16 %v426_v3, %v425_v2 }
 0x1df   :  { %641 = vmatpush3.bf16.msra.mxu0 %v433_v5 }
 0x1e0   :  { %642 = vmatprep.subr.bf16.mxu0 %v705_v1 }
 0x1e3   :  { %643 = vmatpush3.bf16.msra.mxu0 %v434_v4 }
 0x1e4   :  { %648 = vmatprep.subr.bf16.mxu0 %v705_v1 }
 0x1e6   :  { %645 = vmatmul.mubr.msk.bf16.vlgmr.msra.gmra.mrb[8].mxu0 %vm450_vm14, %v676_v6 }
 0x1e7   :  { %650 = vmatprep.mubr.msk.bf16.mxu0 %vm706_vm0, %v705_v1  ;;  %vm555_vm0 = vcmask 60416  }
 0x2b9   :  { %v488_v8 = vpop.f32.mrb[8].mxu0 }
 0x2ba   :  { %v489_v9 = vadd.f32 %v488_v8, %v438_v7  ;;  %v646_v10 = vpop.f32.mrb[9].mxu0 }
 0x2bb   :  { %v491_v12 = vpop.f32.mrb[10].mxu0 }
 0x2bc   :  { %v492_v13 = vadd.f32 %v491_v12, %v443_v11  ;;  %v647_v14 = vpop.f32.mrb[11].mxu0  ;;  %v495_v15 = vmax.f32 %v489_v9, 0.0 }
 0x2be   :  { %v496_v16 = vmax.f32 %v492_v13, 0.0 }
 0x2c0   :  { %v499_v17 = vpack.c.bf16 %v496_v16, %v495_v15 }
 0x2c2   :  { %649 = vmatpush3.bf16.msra.mxu0 %v499_v17 }
 0x2c5   :  { %651 = vmatmul.mubr.msk.bf16.vlgmr.msra.gmra.mrb[12].mxu0 %vm505_vm15, %v497_v18 }
 0x398   :  { %v543_v1 = vpop.f32.mrb[12].mxu0 }
 0x399   :  { %v544_v20 = vadd.f32 %v543_v1, %v503_v19  ;;  %v652_v21 = vpop.f32.mrb[13].mxu0 }
 0x39a   :  { %v546_v22 = vpop.f32.mrb[14].mxu0 }
 0x39b   :  { %v591_v23 = vmul.f32 -1.442695, %v544_v20  ;;  %v653_v24 = vpop.f32.mrb[15].mxu0 }
 0x39d   :  { %677 = vpow2.f32 %v591_v23 }
 0x3a7   :  { %v678_v25 = vpop.eup %677 }
 0x3a8   :  { %v552_v26 = vadd.f32 1.0, %v678_v25 }
 0x3aa   :  { %679 = vrcp.f32 %v552_v26 }
 0x3b4   :  { %v680_v27 = vpop.eup %679 }
 0x3b5   :  { %556 = vst.msk [vmem:[#allocation2] sm:$0xf] %vm555_vm0, %v680_v27 }
 0x3b6   :  { %692 = shalt.err (!%p689_p4)
}
 0x3b7   :  { %s693_s13 = scalar_lea.hbm %s878_s12, 64 }
 0x3b8   :  { %p694_p5 = scmp.ne.s32.totalorder %s878_s12, %s693_s13  ;;  %p697_p6 = scmp.lt.u32.totalorder %s693_s13, %s878_s12 }
 0x3ba   :  { %p699_p7 = pnand %p697_p6, %p694_p5 }
 0x3bc   :  { %702 = shalt.err (!%p699_p7)
}
 0x3bd   :  { %566 = dma.vmem_to_hbm [thread:$0]  %s564_s29, 64, %s878_s12, [#allocation3]  }
 0x3be   :  { %703 = dma.done.wait [#allocation3], 64  }
 0x3bf   :  { %704 = vsyncadd [#allocation3], 4294967232 }
 0x3c0   :  { %570 = vsyncpa [#allocation3], 1 }

</bundles_post_ra>
